<compile_context>
chip_gen: v6e
topology: v6e:2x2x1
jax: 0.10.0
libtpu: 0.0.40
codegen_flags: <defaults>
</compile_context>

<pallas_src>
import functools

import jax
import jax.numpy as jnp
from jax import lax
from jax.experimental import pallas as pl
from jax.experimental.pallas import tpu as pltpu


def _round_up(a, b):
    return (a + b - 1) // b * b


def _vmem_limit_bytes():
    # ~100 MiB on v5e/v6e (128 MiB physical), ~54 MiB on v7x (64 MiB
    # physical), with headroom for Mosaic internal scratch.
    try:
        cap = pltpu.get_tpu_info().vmem_capacity_bytes
    except Exception:
        cap = 64 * 1024 * 1024
    return int(min(100 * 1024 * 1024, int(cap * 0.85)))


def _grouped_expert_kernel(te_ref, tv_ref, x_ref, w1_ref, b1_ref, w2_ref,
                           b2_ref, s_ref, y_ref):
    """One grid step = one tm-row tile of expert-sorted tokens, all owned by
    expert te_ref[t].  Runs the `Expert` MLP (Linear -> ReLU -> Linear) on the
    tile, scales each row by its combine weight and stores it.  Tiles past the
    last used tile (tv == 0) are zero-filled and skip all compute."""
    t = pl.program_id(0)
    valid = tv_ref[t] != 0

    @pl.when(valid)
    def _compute():
        x = x_ref[...]                                            # (tm, emb) bf16
        # Expert forward: relu(x @ W1 + b1) @ W2 + b2, f32 accumulation on MXU.
        h = jnp.dot(x, w1_ref[0],
                    preferred_element_type=jnp.float32) + b1_ref[0]
        h = jnp.maximum(h, 0.0)
        o = jnp.dot(h.astype(w2_ref.dtype), w2_ref[0],
                    preferred_element_type=jnp.float32) + b2_ref[0]
        # Per-row top-k combine weight, read directly (no iota/where/reduce).
        y_ref[...] = (s_ref[...] * o).astype(y_ref.dtype)

    @pl.when(jnp.logical_not(valid))
    def _skip():
        y_ref[...] = jnp.zeros_like(y_ref)


@functools.partial(jax.jit, static_argnames=("top_k",))
def moe_forward(x, params, top_k):
    """MoE forward. x: (..., emb). Returns same shape/dtype as x."""
    w1, b1, w2, b2, wg, bg = (params[k] for k in
                              ("w1", "b1", "w2", "b2", "wg", "bg"))
    num_experts, emb, _ = w1.shape
    x_shape = x.shape
    x2d = x.reshape(-1, emb)
    n = x2d.shape[0]

    # ---- gate (plain JAX, f32): softmax -> top-k -> renormalise ----
    xf = x2d.astype(jnp.float32)
    gate_logits = xf @ wg.astype(jnp.float32).T + bg.astype(jnp.float32)
    gate_probs = jax.nn.softmax(gate_logits, axis=-1)          # (N, E)
    top_p, top_i = lax.top_k(gate_probs, top_k)                # (N, top_k)
    # Standard top-k renorm (== softmax over the selected logits).
    # TODO(synk): confirm this matches the moe.py gating convention.
    top_p = top_p / jnp.sum(top_p, axis=-1, keepdims=True)

    # ---- grouped-matmul dispatch: expand x top_k, sort by expert ----
    n_rows = n * top_k
    # tm: multiple of 16 (bf16 sublanes), capped at 512, and small enough that
    # even tiny inputs produce >= 2 tiles (v7x megacore).
    tm = min(512, _round_up(max((n_rows + 1) // 2, 1), 16))
    n_tiles_max = _round_up(n_rows, tm) // tm + num_experts    # static bound
    p_rows = n_tiles_max * tm

    flat_expert = top_i.reshape(-1).astype(jnp.int32)          # (n_rows,)
    flat_scale = top_p.reshape(-1)                             # (n_rows,)
    flat_token = jnp.repeat(jnp.arange(n, dtype=jnp.int32), top_k)

    order = jnp.argsort(flat_expert)
    sorted_expert = flat_expert[order]
    sorted_scale = flat_scale[order]
    sorted_token = flat_token[order]

    counts = jnp.bincount(flat_expert, length=num_experts).astype(jnp.int32)
    unpadded_starts = (jnp.cumsum(counts) - counts).astype(jnp.int32)
    padded_sizes = ((counts + tm - 1) // tm) * tm              # group -> mult of tm
    padded_ends = jnp.cumsum(padded_sizes).astype(jnp.int32)
    padded_starts = (padded_ends - padded_sizes).astype(jnp.int32)

    # Destination row of every (token, expert) pair in the padded sorted layout.
    dest = (padded_starts[sorted_expert]
            + jnp.arange(n_rows, dtype=jnp.int32)
            - unpadded_starts[sorted_expert])

    row_token = jnp.full((p_rows,), n, dtype=jnp.int32).at[dest].set(sorted_token)
    row_scale = jnp.zeros((p_rows,), jnp.float32).at[dest].set(sorted_scale)
    row_scale = row_scale[:, None]                             # (p_rows, 1)

    # Gather tokens into expert-sorted order (bf16 hot path, zero pad row at n).
    x_pad = jnp.concatenate(
        [x2d.astype(jnp.bfloat16), jnp.zeros((1, emb), jnp.bfloat16)], axis=0)
    x_sorted = x_pad[row_token]                                # (p_rows, emb)

    # Per-tile metadata (scalar prefetch -> SMEM).  Padded group boundaries
    # are multiples of tm, so every tile is owned by exactly one expert.
    num_used_tiles = jnp.sum((counts + tm - 1) // tm)
    tile_start = jnp.arange(n_tiles_max, dtype=jnp.int32) * tm
    tile_expert = jnp.minimum(
        jnp.searchsorted(padded_ends, tile_start, side="right"),
        num_experts - 1).astype(jnp.int32)
    tile_valid = (jnp.arange(n_tiles_max) < num_used_tiles).astype(jnp.int32)

    w1_bf = w1.astype(jnp.bfloat16)
    w2_bf = w2.astype(jnp.bfloat16)
    b1_r = b1.reshape(num_experts, 1, emb).astype(jnp.float32)
    b2_r = b2.reshape(num_experts, 1, emb).astype(jnp.float32)

    y_rows = pl.pallas_call(
        _grouped_expert_kernel,
        out_shape=jax.ShapeDtypeStruct((p_rows, emb), jnp.float32),
        grid_spec=pltpu.PrefetchScalarGridSpec(
            num_scalar_prefetch=2,                 # tile_expert, tile_valid
            grid=(n_tiles_max,),
            in_specs=[
                # Expert-sorted token tile (fetched once per tile).
                pl.BlockSpec((tm, emb), lambda t, te, tv: (t, 0)),
                # Per-expert weight streaming (data-dependent index_map);
                # consecutive same-expert tiles reuse the same block -> no
                # re-DMA, and VMEM holds only one expert's weights at a time.
                pl.BlockSpec((1, emb, emb), lambda t, te, tv: (te[t], 0, 0)),
                pl.BlockSpec((1, 1, emb), lambda t, te, tv: (te[t], 0, 0)),
                pl.BlockSpec((1, emb, emb), lambda t, te, tv: (te[t], 0, 0)),
                pl.BlockSpec((1, 1, emb), lambda t, te, tv: (te[t], 0, 0)),
                # Per-row combine weight column.
                pl.BlockSpec((tm, 1), lambda t, te, tv: (t, 0)),
            ],
            out_specs=pl.BlockSpec((tm, emb), lambda t, te, tv: (t, 0)),
        ),
        compiler_params=pltpu.CompilerParams(
            dimension_semantics=("parallel",),
            vmem_limit_bytes=_vmem_limit_bytes()),
    )(tile_expert, tile_valid, x_sorted, w1_bf, b1_r, w2_bf, b2_r, row_scale)

    # Combine: scatter-add the scaled per-(token, expert) rows back to tokens.
    # Padding rows carry token index n and/or zero rows -> land in the dropped
    # dummy slot.
    y_tok = jnp.zeros((n + 1, emb), jnp.float32).at[row_token].add(y_rows)
    return y_tok[:n].reshape(x_shape).astype(x.dtype)


def moe_reference(x, params, top_k):
    """Dense f32 reference (gate + per-expert Linear->ReLU->Linear + combine)."""
    w1, b1, w2, b2, wg, bg = (params[k] for k in
                              ("w1", "b1", "w2", "b2", "wg", "bg"))
    num_experts, emb, _ = w1.shape
    x2d = x.reshape(-1, emb).astype(jnp.float32)
    probs = jax.nn.softmax(x2d @ wg.T + bg, axis=-1)
    top_p, top_i = lax.top_k(probs, top_k)
    top_p = top_p / jnp.sum(top_p, axis=-1, keepdims=True)
    onehot = (top_i[..., None] == jnp.arange(num_experts)).astype(jnp.float32)
    comb = jnp.sum(top_p[..., None] * onehot, axis=1)          # (N, E)
    y = jnp.zeros_like(x2d)
    for e in range(num_experts):
        h = jnp.maximum(x2d @ w1[e] + b1[e], 0.0)
        y = y + comb[:, e:e + 1] * (h @ w2[e] + b2[e])
    return y.reshape(x.shape)


def init_params(key, emb, num_experts):
    """Deterministic synthetic init matching nn.Linear's U(-1/sqrt(in), 1/sqrt(in)).
    Weights are stored pre-transposed so the kernel computes x @ W."""
    ks = jax.random.split(key, 6)
    s = 1.0 / jnp.sqrt(emb)
    w1 = jax.random.uniform(ks[0], (num_experts, emb, emb), jnp.float32, -s, s)
    b1 = jax.random.uniform(ks[1], (num_experts, emb), jnp.float32, -s, s)
    w2 = jax.random.uniform(ks[2], (num_experts, emb, emb), jnp.float32, -s, s)
    b2 = jax.random.uniform(ks[3], (num_experts, emb), jnp.float32, -s, s)
    wg = jax.random.uniform(ks[4], (num_experts, emb), jnp.float32, -s, s)
    bg = jax.random.uniform(ks[5], (num_experts,), jnp.float32, -s, s)
    return dict(w1=w1, b1=b1, w2=w2, b2=b2, wg=wg, bg=bg)


if __name__ == "__main__":
    emb_size = 32        # NOTE: for real workloads use emb as a multiple of
    num_experts = 4      # 128 so the lane dimension (and MXU) is dense.
    top_k = 2
    batch, seq = 2, 8

    key = jax.random.PRNGKey(0)
    k_param, k_x = jax.random.split(key)
    params = init_params(k_param, emb_size, num_experts)
    x = jax.random.normal(k_x, (batch, seq, emb_size), dtype=jnp.float32)

    y = moe_forward(x, params, top_k)
    jax.block_until_ready(y)
    assert y.shape == x.shape

    # Loose tolerance: kernel uses bf16 operands with f32 accumulation.
    y_ref = moe_reference(x, params, top_k)
    err = float(jnp.max(jnp.abs(y - y_ref)))
    assert err < 3e-2, f"max abs error vs reference: {err}"
    print("KERNEL_OK")
</pallas_src>

<mosaic_0001>
module attributes {stable_mosaic.version = 11 : i64} {
  func.func private @main(%arg0: i32) attributes {dimension_semantics = [#tpu.dimension_semantics<core_parallel>], iteration_bounds = array<i64: 2>, tpu.core_type = #tpu.core_type<sc_scalar_subcore>, window_params = []} {
    return
  }
}

module attributes {stable_mosaic.version = 11 : i64} {
  func.func private @main(%arg0: i32) attributes {dimension_semantics = [#tpu.dimension_semantics<core_parallel>], iteration_bounds = array<i64: 2>, tpu.core_type = #tpu.core_type<sc_scalar_subcore>, window_params = []} {
    return
  }
}

module attributes {stable_mosaic.version = 11 : i64} {
  func.func @_grouped_expert_kernel(%arg0: i32, %arg1: memref<6xi32, #tpu.memory_space<smem>>, %arg2: memref<6xi32, #tpu.memory_space<smem>>, %arg3: memref<16x32xbf16, #tpu.memory_space<vmem>>, %arg4: memref<1x32x32xbf16, #tpu.memory_space<vmem>>, %arg5: memref<1x1x32xf32, #tpu.memory_space<vmem>>, %arg6: memref<1x32x32xbf16, #tpu.memory_space<vmem>>, %arg7: memref<1x1x32xf32, #tpu.memory_space<vmem>>, %arg8: memref<16x1xf32, #tpu.memory_space<vmem>>, %arg9: memref<16x32xf32, #tpu.memory_space<vmem>>) attributes {dimension_semantics = [#tpu.dimension_semantics<parallel>], iteration_bounds = array<i64: 6>, scalar_prefetch = 2 : i64, scratch_operands = 0 : i64, tpu.core_type = #tpu.core_type<tc>, window_params = [{transform_indices = @transform_0, window_bounds = array<i64: 16, 32>}, {transform_indices = @transform_1, window_bounds = array<i64: 1, 32, 32>}, {transform_indices = @transform_2, window_bounds = array<i64: 1, 1, 32>}, {transform_indices = @transform_3, window_bounds = array<i64: 1, 32, 32>}, {transform_indices = @transform_4, window_bounds = array<i64: 1, 1, 32>}, {transform_indices = @transform_5, window_bounds = array<i64: 16, 1>}, {transform_indices = @transform_6, window_bounds = array<i64: 16, 32>}]} {
    %0 = arith.index_cast %arg0 : i32 to index
    %1 = memref.load %arg2[%0] : memref<6xi32, #tpu.memory_space<smem>>
    %c0_i32 = arith.constant 0 : i32
    %2 = arith.cmpi ne, %1, %c0_i32 : i32
    %3 = arith.extui %2 : i1 to i32
    %c0_i32_0 = arith.constant 0 : i32
    %4 = arith.cmpi ne, %3, %c0_i32_0 : i32
    scf.if %4 {
      %c0 = arith.constant 0 : index
      %c0_2 = arith.constant 0 : index
      %8 = vector.load %arg3[%c0, %c0_2] : memref<16x32xbf16, #tpu.memory_space<vmem>>, vector<16x32xbf16>
      %c0_3 = arith.constant 0 : index
      %c0_4 = arith.constant 0 : index
      %c0_5 = arith.constant 0 : index
      %9 = vector.load %arg4[%c0_3, %c0_4, %c0_5] : memref<1x32x32xbf16, #tpu.memory_space<vmem>>, vector<1x32x32xbf16>
      %10 = vector.shape_cast %9 : vector<1x32x32xbf16> to vector<32x32xbf16>
      %cst = arith.constant dense<0.000000e+00> : vector<16x32xf32>
      %11 = tpu.matmul %8, %10, %cst {dimension_numbers = #tpu.dot_dimension_numbers<[1], [0], [0], [1], [0, 0, 1, 1], [], []>} : vector<16x32xbf16>, vector<32x32xbf16>, vector<16x32xf32> -> vector<16x32xf32>
      %c0_6 = arith.constant 0 : index
      %c0_7 = arith.constant 0 : index
      %c0_8 = arith.constant 0 : index
      %12 = vector.load %arg5[%c0_6, %c0_7, %c0_8] : memref<1x1x32xf32, #tpu.memory_space<vmem>>, vector<1x1x32xf32>
      %13 = vector.shape_cast %12 : vector<1x1x32xf32> to vector<1x32xf32>
      %14 = vector.broadcast %13 : vector<1x32xf32> to vector<16x32xf32>
      %15 = arith.addf %11, %14 : vector<16x32xf32>
      %cst_9 = arith.constant 0.000000e+00 : f32
      %16 = vector.broadcast %cst_9 : f32 to vector<16x32xf32>
      %17 = arith.maximumf %15, %16 : vector<16x32xf32>
      %18 = arith.truncf %17 : vector<16x32xf32> to vector<16x32xbf16>
      %c0_10 = arith.constant 0 : index
      %c0_11 = arith.constant 0 : index
      %c0_12 = arith.constant 0 : index
      %19 = vector.load %arg6[%c0_10, %c0_11, %c0_12] : memref<1x32x32xbf16, #tpu.memory_space<vmem>>, vector<1x32x32xbf16>
      %20 = vector.shape_cast %19 : vector<1x32x32xbf16> to vector<32x32xbf16>
      %cst_13 = arith.constant dense<0.000000e+00> : vector<16x32xf32>
      %21 = tpu.matmul %18, %20, %cst_13 {dimension_numbers = #tpu.dot_dimension_numbers<[1], [0], [0], [1], [0, 0, 1, 1], [], []>} : vector<16x32xbf16>, vector<32x32xbf16>, vector<16x32xf32> -> vector<16x32xf32>
      %c0_14 = arith.constant 0 : index
      %c0_15 = arith.constant 0 : index
      %c0_16 = arith.constant 0 : index
      %22 = vector.load %arg7[%c0_14, %c0_15, %c0_16] : memref<1x1x32xf32, #tpu.memory_space<vmem>>, vector<1x1x32xf32>
      %23 = vector.shape_cast %22 : vector<1x1x32xf32> to vector<1x32xf32>
      %24 = vector.broadcast %23 : vector<1x32xf32> to vector<16x32xf32>
      %25 = arith.addf %21, %24 : vector<16x32xf32>
      %c0_17 = arith.constant 0 : index
      %c0_18 = arith.constant 0 : index
      %26 = vector.load %arg8[%c0_17, %c0_18] : memref<16x1xf32, #tpu.memory_space<vmem>>, vector<16x1xf32>
      %27 = vector.broadcast %26 : vector<16x1xf32> to vector<16x32xf32>
      %28 = arith.mulf %27, %25 : vector<16x32xf32>
      %c0_19 = arith.constant 0 : index
      %c0_20 = arith.constant 0 : index
      %29 = vector.load %arg9[%c0_19, %c0_20] : memref<16x32xf32, #tpu.memory_space<vmem>>, vector<16x32xf32>
      tpu.vector_store %arg9[%c0_19, %c0_20], %28 {strides = array<i32>} : memref<16x32xf32, #tpu.memory_space<vmem>>, vector<16x32xf32>,
    } else {
    }
    %true = arith.constant true
    %5 = arith.xori %2, %true : i1
    %6 = arith.extui %5 : i1 to i32
    %c0_i32_1 = arith.constant 0 : i32
    %7 = arith.cmpi ne, %6, %c0_i32_1 : i32
    scf.if %7 {
      %cst = arith.constant 0.000000e+00 : f32
      %8 = vector.broadcast %cst : f32 to vector<16x32xf32>
      %c0 = arith.constant 0 : index
      %c0_2 = arith.constant 0 : index
      %9 = vector.load %arg9[%c0, %c0_2] : memref<16x32xf32, #tpu.memory_space<vmem>>, vector<16x32xf32>
      tpu.vector_store %arg9[%c0, %c0_2], %8 {strides = array<i32>} : memref<16x32xf32, #tpu.memory_space<vmem>>, vector<16x32xf32>,
    } else {
    }
    return
  }
  func.func @transform_0(%arg0: i32, %arg1: memref<6xi32, #tpu.memory_space<smem>>, %arg2: memref<6xi32, #tpu.memory_space<smem>>) -> (i32, i32) {
    %c0_i32 = arith.constant 0 : i32
    %c0_i32_0 = arith.constant 0 : i32
    return %arg0, %c0_i32 : i32, i32
  }
  func.func @transform_1(%arg0: i32, %arg1: memref<6xi32, #tpu.memory_space<smem>>, %arg2: memref<6xi32, #tpu.memory_space<smem>>) -> (i32, i32, i32) {
    %0 = arith.index_cast %arg0 : i32 to index
    %1 = memref.load %arg1[%0] : memref<6xi32, #tpu.memory_space<smem>>
    %c0_i32 = arith.constant 0 : i32
    %c0_i32_0 = arith.constant 0 : i32
    %c0_i32_1 = arith.constant 0 : i32
    return %1, %c0_i32, %c0_i32_0 : i32, i32, i32
  }
  func.func @transform_2(%arg0: i32, %arg1: memref<6xi32, #tpu.memory_space<smem>>, %arg2: memref<6xi32, #tpu.memory_space<smem>>) -> (i32, i32, i32) {
    %0 = arith.index_cast %arg0 : i32 to index
    %1 = memref.load %arg1[%0] : memref<6xi32, #tpu.memory_space<smem>>
    %c0_i32 = arith.constant 0 : i32
    %c0_i32_0 = arith.constant 0 : i32
    %c0_i32_1 = arith.constant 0 : i32
    return %1, %c0_i32, %c0_i32_0 : i32, i32, i32
  }
  func.func @transform_3(%arg0: i32, %arg1: memref<6xi32, #tpu.memory_space<smem>>, %arg2: memref<6xi32, #tpu.memory_space<smem>>) -> (i32, i32, i32) {
    %0 = arith.index_cast %arg0 : i32 to index
    %1 = memref.load %arg1[%0] : memref<6xi32, #tpu.memory_space<smem>>
    %c0_i32 = arith.constant 0 : i32
    %c0_i32_0 = arith.constant 0 : i32
    %c0_i32_1 = arith.constant 0 : i32
    return %1, %c0_i32, %c0_i32_0 : i32, i32, i32
  }
  func.func @transform_4(%arg0: i32, %arg1: memref<6xi32, #tpu.memory_space<smem>>, %arg2: memref<6xi32, #tpu.memory_space<smem>>) -> (i32, i32, i32) {
    %0 = arith.index_cast %arg0 : i32 to index
    %1 = memref.load %arg1[%0] : memref<6xi32, #tpu.memory_space<smem>>
    %c0_i32 = arith.constant 0 : i32
    %c0_i32_0 = arith.constant 0 : i32
    %c0_i32_1 = arith.constant 0 : i32
    return %1, %c0_i32, %c0_i32_0 : i32, i32, i32
  }
  func.func @transform_5(%arg0: i32, %arg1: memref<6xi32, #tpu.memory_space<smem>>, %arg2: memref<6xi32, #tpu.memory_space<smem>>) -> (i32, i32) {
    %c0_i32 = arith.constant 0 : i32
    %c0_i32_0 = arith.constant 0 : i32
    return %arg0, %c0_i32 : i32, i32
  }
  func.func @transform_6(%arg0: i32, %arg1: memref<6xi32, #tpu.memory_space<smem>>, %arg2: memref<6xi32, #tpu.memory_space<smem>>) -> (i32, i32) {
    %c0_i32 = arith.constant 0 : i32
    %c0_i32_0 = arith.constant 0 : i32
    return %arg0, %c0_i32 : i32, i32
  }
}

</mosaic_0001>

<bundles_post_ra>
// kernel: custom-call.1
= control target key start
LH: loop header
LB: loop body
LE: loop exit
PB: predicated region body
PF: predicated region fallthrough
CT: control target
= control target key end

     0   :  { %s6_s0 = inlined_call_operand.vmem [shape: u32[6], index: 0, kind: output, shape index: {}]  }

// kernel: moe_forward.1
= control target key start
LH: loop header
LB: loop body
LE: loop exit
PB: predicated region body
PF: predicated region fallthrough
CT: control target
= control target key end

     0   :  { %s898_s0 = inlined_call_operand.vmem [shape: s32[6], index: 0, kind: input, shape index: {}]   ;;  %s899_s2 = inlined_call_operand.vmem [shape: bf16[96,32], index: 2, kind: input, shape index: {}]   ;;  %s900_s3 = inlined_call_operand.vmem [shape: bf16[4,32,32], index: 3, kind: input, shape index: {}]   ;;  %s901_s4 = inlined_call_operand.vmem [shape: f32[4,1,32], index: 4, kind: input, shape index: {}]   ;;  %s902_s5 = inlined_call_operand.vmem [shape: bf16[4,32,32], index: 5, kind: input, shape index: {}]   ;;  %s903_s6 = inlined_call_operand.vmem [shape: f32[4,1,32], index: 6, kind: input, shape index: {}]   ;;  %s904_s7 = inlined_call_operand.vmem [shape: f32[96,1], index: 7, kind: input, shape index: {}]   ;;  %s905_s8 = inlined_call_operand.vmem [shape: f32[96,32], index: 8, kind: output, shape index: {}]   ;;  %s906_s1 = inlined_call_operand.vmem [shape: s32[6], index: 1, kind: input, shape index: {}]  }
   0x1   :  { %s13_s29 = sshll.u32 %s898_s0, 4  ;;  %s17_s10 = sshll.u32 %s906_s1, 4  ;;  %s14_s29 = int_to_ptr.vmem [resolvable:$true] %s13_s29  ;;  %s18_s10 = int_to_ptr.vmem [resolvable:$true] %s17_s10 }
   0x2   :  { %s741_s11 = scalar_lea.vmem %s14_s29, 16  ;;  %p746_p1 = scmp.lt.s32.totalorder %s14_s29, %s14_s29 }
   0x3   :  { %p742_p0 = scmp.ne.s32.totalorder %s14_s29, %s741_s11  ;;  %p747_p2 = scmp.lt.s32.totalorder %s741_s11, %s741_s11 }
   0x5   :  { %p748_p3 = por %p747_p2, %p746_p1 }
   0x7   :  { %p749_p4 = pnand %p748_p3, %p742_p0 }
   0x9   :  { %752 = shalt.err (!%p749_p4)  }
   0xa   :  { %s775_s12 = smov [#allocation3]   ;;  %s753_s13 = scalar_lea.vmem %s18_s10, 16 }
   0xb   :  { %16 = dma.vmem_to_smem %s14_s29, 16, %s775_s12, [#allocation2] }
   0xc   :  { %p754_p5 = scmp.ne.s32.totalorder %s18_s10, %s753_s13  ;;  %p758_p6 = scmp.lt.s32.totalorder %s18_s10, %s18_s10 }
   0xd   :  { %p759_p7 = scmp.lt.s32.totalorder %s753_s13, %s753_s13 }
   0xf   :  { %p760_p8 = por %p759_p7, %p758_p6 }
  0x11   :  { %p761_p9 = pnand %p760_p8, %p754_p5 }
  0x13   :  { %764 = shalt.err (!%p761_p9)  }
  0x14   :  { %s776_s0 = smov [#allocation4]  }
  0x15   :  { %20 = dma.vmem_to_smem %s18_s10, 16, %s776_s0, [#allocation2] }
  0x16   :  { %769 = dma.done.wait [#allocation2], 32 }
  0x17   :  { %770 = vsyncadd [#allocation2], 4294967264 }
  0x18   :  { %22 = sfence }
  0x19   :  { %s832_s1 = smov 0  }
  0x1a LB: > { %s669_s14 = sadd.s32 4294967295, %s773_s1   ;;  %p673_p10 = scmp.ge.s32.totalorder %s773_s1, 1  ;;  %s773_s1 = sphi %s832_s1, %s28_s1  }
  0x1b   : > { %p288_p11 = scmp.lt.s32.totalorder %s773_s1, 7 }
  0x1d   : > { %p289_p12 = pnand %p673_p10, %p288_p11 }
  0x1e   : > { %s674_s15 = sshll.u32 (!%p289_p12), %s669_s14, 1  ;;  %s349_s16 = sld [smem:[#allocation3 + %s669_s14]] (!%p289_p12) }
  0x1f   : > { %292 = sbr.rel (%p289_p12) target bundleno = 476 (0x1dc), region = 44  ;;  %p344_p13 = scmp.lt.s32.totalorder (!%p289_p12), %s674_s15, 11 }
  0x20   : > { %s356_s17 = sld [smem:[#allocation3 + %s669_s14]] (!%p289_p12) }
  0x21   : > { %s361_s18 = sld [smem:[#allocation3 + %s669_s14]] (!%p289_p12) }
  0x22   : > { %s368_s19 = sld [smem:[#allocation3 + %s669_s14]] (!%p289_p12) }
  0x23   : > { %s862_s22 = sld [smem:[#allocation4 + %s669_s14]] (!%p289_p12) }
  0x24   : > { %s908_s15 = smov (!%p344_p13, %s674_s15), 11  ;;  %p350_p0 = scmp.lt.s32.totalorder %s349_s16, 3 }
  0x25   : > { %s675_s20 = sshll.u32 %s908_s15, 2  ;;  %s681_s21 = sshll.u32 %s908_s15, 3 }
  0x26   : > { %s347_s24 = scalar_lea.vmem %s899_s2, %s675_s20  ;;  %p357_p1 = scmp.lt.s32.totalorder %s356_s17, 3 }
  0x27   : > { %s846_s27 = scalar_lea.vmem %s904_s7, %s681_s21  ;;  %s910_s16 = smov (!%p350_p0, %s349_s16), 3 }
  0x28   : > { %s912_s17 = smov (!%p357_p1, %s356_s17), 3  ;;  %s697_s28 = sshll.u32 %s910_s16, 4 }
  0x29   : > { %p362_p2 = scmp.lt.s32.totalorder %s361_s18, 3  ;;  %s354_s9 = scalar_lea.vmem %s900_s3, %s697_s28 }
  0x2a   : > { %s359_s12 = scalar_lea.vmem %s901_s4, %s912_s17  ;;  %p369_p3 = scmp.lt.s32.totalorder %s368_s19, 3 }
  0x2b   : > { %s914_s18 = smov (!%p362_p2, %s361_s18), 3  ;;  %s860_s15 = scalar_lea.vmem %s905_s8, %s681_s21 }
  0x2c   : > { %s698_s20 = sshll.u32 %s914_s18, 4  ;;  %s916_s19 = smov (!%p369_p3, %s368_s19), 3 }
  0x2d   : > { %s366_s25 = scalar_lea.vmem %s902_s5, %s698_s20  ;;  %s371_s29 = scalar_lea.vmem %s903_s6, %s916_s19 }
  0x2e   : > { %p684_p4 = scmp.eq.s32.totalorder %s862_s22, 0 }
  0x30   : > { %390 = sbr.rel (%p684_p4) target bundleno = 467 (0x1d3), region = 48 }
  0x35   : > { %v736_v0 = vld [vmem:[%s354_s9 + $0x8] sm:$0xff]   ;;  %v777_v1 = vmov 0.0   ;;  %v737_v2 = vld [vmem:[%s354_s9] sm:$0xff]   ;;  %vm778_vm0 = vmmov 0   ;;  %vm421_vm1 = vcmask 261120   ;;  %v779_v7 = vmov 0  }
  0x36   : > { %705 = vmatprep.subr.bf16.mxu0 %v777_v1  ;;  %713 = vmatprep.subr.bf16.mxu1 %v777_v1  ;;  %v738_v3 = vld [vmem:[%s347_s24] sm:$0xff]   ;;  %v739_v4 = vld [vmem:[%s366_s25 + $0x8] sm:$0xff]  }
  0x37   : > { %706 = vmatpush3.bf16.msra.mxu0 %v736_v0  ;;  %709 = vmatprep.mubr.msk.bf16.mxu0 %vm778_vm0, %v777_v1  ;;  %v740_v5 = vld [vmem:[%s366_s25] sm:$0xff]   ;;  %v537_v8 = vld [vmem:[%s846_s27 + $0x8] sm:$0xff] }
  0x38   : > { %707 = vmatprep.subr.bf16.mxu0 %v777_v1  ;;  %717 = vmatprep.mubr.msk.bf16.mxu1 %vm778_vm0, %v777_v1  ;;  %v536_v6 = vld [vmem:[%s846_s27] sm:$0xff] }
  0x39   : > { %714 = vmatpush3.bf16.msra.mxu1 %v739_v4  ;;  %735 = vset.pattern.permute.xlu0 %v779_v7  ;;  %v685_v9 = vld [vmem:[%s359_s12] ss:$0 sm:$0xff] }
  0x3a   : > { %715 = vmatprep.subr.bf16.mxu1 %v777_v1  ;;  %540 = vperm.xlu0 %735, %v536_v6   ;;  %v690_v19 = vld [vmem:[%s371_s29] ss:$0 sm:$0xff] }
  0x3b   : > { %708 = vmatpush3.bf16.msra.mxu0 %v737_v2 }
  0x3d   : > { %716 = vmatpush3.bf16.msra.mxu1 %v740_v5 }
  0x3e   : > { %710 = vmatmul.mubr.msk.bf16.vlgmr.msra.gmra.mxu0 %vm421_vm1, %v738_v3  ;;  %545 = vperm.xlu0 %735, %v537_v8  }
  0xb5   : > { %v541_v20 = vpop.permute.xlu0 %540 }
  0xb9   : > { %v546_v27 = vpop.permute.xlu0 %545 }
  0xfe   : > { %v459_v10 = vpop.f32.mrf.mxu0 }
  0xff   : > { %v460_v12 = vadd.f32 %v685_v9, %v459_v10 }
 0x100   : > { %v711_v11 = vpop.f32.mrf.mxu0 }
 0x101   : > { %v466_v16 = vmax.f32 %v460_v12, 0.0 }
 0x102   : > { %v462_v13 = vpop.f32.mrf.mxu0 }
 0x103   : > { %v463_v14 = vadd.f32 %v685_v9, %v462_v13 }
 0x104   : > { %v712_v15 = vpop.f32.mrf.mxu0 }
 0x105   : > { %v467_v17 = vmax.f32 %v463_v14, 0.0 }
 0x107   : > { %v468_v18 = vpack.c.bf16 %v467_v17, %v466_v16 }
 0x109   : > { %718 = vmatmul.mubr.msk.bf16.vlgmr.msra.gmra.mxu1 %vm421_vm1, %v468_v18 }
 0x1c9   : > { %v529_v21 = vpop.f32.mrf.mxu1 }
 0x1ca   : > { %v530_v22 = vadd.f32 %v690_v19, %v529_v21 }
 0x1cb   : > { %v719_v23 = vpop.f32.mrf.mxu1 }
 0x1cc   : > { %v548_v24 = vmul.f32 %v541_v20, %v530_v22 }
 0x1cd   : > { %v532_v25 = vpop.f32.mrf.mxu1 }
 0x1ce   : > { %550 = vst.msk [vmem:[%s860_s15] sm:$0xff] %vm421_vm1, %v548_v24  ;;  %v533_v26 = vadd.f32 %v690_v19, %v532_v25 }
 0x1cf   : > { %v720_v28 = vpop.f32.mrf.mxu1 }
 0x1d0   : > { %v549_v29 = vmul.f32 %v546_v27, %v533_v26 }
 0x1d2   : > { %551 = vst.msk [vmem:[%s860_s15 + $0x8] sm:$0xff] %vm421_vm1, %v549_v29 }
 0x1d3 PF: > { %p694_p5 = scmp.ne.s32.totalorder %s862_s22, 0 }
 0x1d5   : > { %555 = sbr.rel (%p694_p5) target bundleno = 476 (0x1dc), region = 52 }
 0x1da   : > { %vm556_vm2 = vcmask 261120   ;;  %v780_v30 = vmov 0.0  }
 0x1db   : > { %557 = vst.msk [vmem:[%s860_s15] sm:$0xff] %vm556_vm2, %v780_v30  ;;  %558 = vst.msk [vmem:[%s860_s15 + $0x8] sm:$0xff] %vm556_vm2, %v780_v30 }
 0x1dc PF: > { %s28_s1 = sadd.s32 1, %s773_s1  }
 0x1dd   : > { %p25_p6 = scmp.ge.s32.totalorder %s28_s1, 8  }
 0x1df   :  { %27 = sbr.rel (!%p25_p6) target bundleno = 26 (0x1a), region = 97 }

</bundles_post_ra>
